<compile_context>
chip_gen: v6e
topology: v6e:2x2x1
jax: 0.10.0
libtpu: 0.0.40
codegen_flags: <defaults>
</compile_context>

<pallas_src>
import functools

import jax
import jax.numpy as jnp
from jax.experimental import pallas as pl
from jax.experimental.pallas import tpu as pltpu

LANES = 128
MAX_BLOCK_ROWS = 2048          # (2048, 128) f32 tile = 1 MiB per input per step


def _sigmoid(x):
    # One transcendental on the EUP instead of exp + divide.
    return 0.5 * (jnp.tanh(0.5 * x) + 1.0)


def _dice_kernel(x_ref, t_ref, o_ref, acc_i, acc_st, *,
                 n_blocks, block_rows, total, needs_mask):
    i = pl.program_id(0)

    @pl.when(i == 0)
    def _():
        acc_i[...] = jnp.zeros_like(acc_i)
        acc_st[...] = jnp.zeros_like(acc_st)

    def accumulate(mask_last):
        s = _sigmoid(x_ref[...].astype(jnp.float32))   # upcast in-kernel
        t = t_ref[...].astype(jnp.float32)
        if mask_last:
            # Only reached on the single last block when it is partial.  The
            # flat-index mask zeroes both out-of-range rows (garbage read by
            # the partial edge block) and padded lanes of the ragged last row.
            base = (n_blocks - 1) * block_rows          # first global row
            rows_full = total // LANES - base           # fully valid local rows
            rem = total % LANES                         # valid lanes of row rows_full
            row_ids = jax.lax.broadcasted_iota(jnp.int32, s.shape, 0)
            if rem:
                lane_ids = jax.lax.broadcasted_iota(jnp.int32, s.shape, 1)
                keep = (row_ids < rows_full) | (
                    (row_ids == rows_full) & (lane_ids < rem))
            else:
                keep = row_ids < rows_full
            s = jnp.where(keep, s, 0.0)
            t = jnp.where(keep, t, 0.0)
        acc_i[...] += s * t
        acc_st[...] += s + t

    if needs_mask:
        @pl.when(i < n_blocks - 1)
        def _():
            accumulate(False)

        @pl.when(i == n_blocks - 1)
        def _():
            accumulate(True)
    else:
        # Every block is full: never mask.
        accumulate(False)

    @pl.when(i == n_blocks - 1)
    def _():
        # Per-lane partial sums; the tiny cross-lane reduce + dice formula run
        # in plain JAX on the (2, 128) result.
        o_ref[0:1, :] = jnp.sum(acc_i[...], axis=0, keepdims=True)
        o_ref[1:2, :] = jnp.sum(acc_st[...], axis=0, keepdims=True)


def dice_loss(inputs, targets, smooth=1.0):
    """Pallas TPU implementation of DiceLoss.forward (returns f32 scalar)."""
    x = inputs.reshape(-1)
    t = targets.reshape(-1)
    total = x.shape[0]

    # TODO(synk): ragged sizes (numel % 128 != 0) still pay one wrapper-side
    # pad copy; removing it entirely needs 1-D blocks or manual DMA.  The pad
    # value is irrelevant (zeros) -- the kernel masks padded lanes by index.
    lane_pad = (-total) % LANES
    if lane_pad:
        x = jnp.pad(x, (0, lane_pad))
        t = jnp.pad(t, (0, lane_pad))
    rows = (total + lane_pad) // LANES

    block_rows = min(MAX_BLOCK_ROWS, ((rows + 7) // 8) * 8)
    n_blocks = pl.cdiv(rows, block_rows)
    needs_mask = total != n_blocks * block_rows * LANES

    x = x.reshape(rows, LANES)                     # free row-major reshapes
    t = t.reshape(rows, LANES)

    kernel = functools.partial(
        _dice_kernel, n_blocks=n_blocks, block_rows=block_rows,
        total=total, needs_mask=needs_mask)

    # VMEM budget: 2 double-buffered inputs + 2 f32 accumulators + headroom.
    in_bytes = 2 * block_rows * LANES * (x.dtype.itemsize + t.dtype.itemsize)
    acc_bytes = 2 * block_rows * LANES * 4
    vmem_limit = int(max(in_bytes + acc_bytes + (4 << 20), 16 << 20))

    partials = pl.pallas_call(
        kernel,
        out_shape=jax.ShapeDtypeStruct((2, LANES), jnp.float32),
        grid_spec=pltpu.PrefetchScalarGridSpec(
            num_scalar_prefetch=0,
            grid=(n_blocks,),
            in_specs=[
                pl.BlockSpec((block_rows, LANES), lambda i: (i, 0)),
                pl.BlockSpec((block_rows, LANES), lambda i: (i, 0)),
            ],
            out_specs=pl.BlockSpec((2, LANES), lambda i: (0, 0)),
            scratch_shapes=[
                pltpu.VMEM((block_rows, LANES), jnp.float32),
                pltpu.VMEM((block_rows, LANES), jnp.float32),
            ],
        ),
        compiler_params=pltpu.CompilerParams(
            dimension_semantics=("arbitrary",),
            vmem_limit_bytes=vmem_limit,
        ),
    )(x, t)

    inter = jnp.sum(partials[0])
    st_sum = jnp.sum(partials[1])
    dice = (2.0 * inter + smooth) / (st_sum + smooth)
    return 1.0 - dice


def dice_loss_ref(inputs, targets, smooth=1.0):
    s = jax.nn.sigmoid(inputs.reshape(-1).astype(jnp.float32))
    t = targets.reshape(-1).astype(jnp.float32)
    inter = jnp.sum(s * t)
    dice = (2.0 * inter + smooth) / (jnp.sum(s) + jnp.sum(t) + smooth)
    return 1.0 - dice


if __name__ == "__main__":
    key = jax.random.PRNGKey(0)
    k1, k2 = jax.random.split(key)
    # Inputs consistent with a segmentation-logit use case: NCHW (2, 4, 16, 16).
    logits = jax.random.normal(k1, (2, 4, 16, 16), dtype=jnp.float32)
    targets = jax.random.bernoulli(k2, 0.3, (2, 4, 16, 16)).astype(jnp.float32)

    loss_fn = jax.jit(dice_loss)
    loss = jax.block_until_ready(loss_fn(logits, targets))
    ref = dice_loss_ref(logits, targets, smooth=1.0)
    assert jnp.allclose(loss, ref, atol=1e-5, rtol=1e-5), (loss, ref)
    print("KERNEL_OK")
</pallas_src>

<mosaic_0001>
module attributes {stable_mosaic.version = 11 : i64} {
  func.func @_dice_kernel(%arg0: i32, %arg1: memref<16x128xf32, #tpu.memory_space<vmem>>, %arg2: memref<16x128xf32, #tpu.memory_space<vmem>>, %arg3: memref<2x128xf32, #tpu.memory_space<vmem>>, %arg4: memref<16x128xf32, #tpu.memory_space<vmem>>, %arg5: memref<16x128xf32, #tpu.memory_space<vmem>>) attributes {dimension_semantics = [#tpu.dimension_semantics<arbitrary>], iteration_bounds = array<i64: 1>, scalar_prefetch = 0 : i64, scratch_operands = 2 : i64, tpu.core_type = #tpu.core_type<tc>, window_params = [{transform_indices = @transform_0, window_bounds = array<i64: 16, 128>}, {transform_indices = @transform_1, window_bounds = array<i64: 16, 128>}, {pipeline_mode = #tpu.pipeline_mode<synchronous>, transform_indices = @transform_2, window_bounds = array<i64: 2, 128>}]} {
    %c0_i32 = arith.constant 0 : i32
    %0 = arith.cmpi eq, %arg0, %c0_i32 : i32
    %1 = arith.extui %0 : i1 to i32
    %c0_i32_0 = arith.constant 0 : i32
    %2 = arith.cmpi ne, %1, %c0_i32_0 : i32
    scf.if %2 {
      %cst_16 = arith.constant 0.000000e+00 : f32
      %23 = vector.broadcast %cst_16 : f32 to vector<16x128xf32>
      %c0_17 = arith.constant 0 : index
      %c0_18 = arith.constant 0 : index
      %24 = vector.load %arg4[%c0_17, %c0_18] : memref<16x128xf32, #tpu.memory_space<vmem>>, vector<16x128xf32>
      tpu.vector_store %arg4[%c0_17, %c0_18], %23 {strides = array<i32>} : memref<16x128xf32, #tpu.memory_space<vmem>>, vector<16x128xf32>,
      %cst_19 = arith.constant 0.000000e+00 : f32
      %25 = vector.broadcast %cst_19 : f32 to vector<16x128xf32>
      %c0_20 = arith.constant 0 : index
      %c0_21 = arith.constant 0 : index
      %26 = vector.load %arg5[%c0_20, %c0_21] : memref<16x128xf32, #tpu.memory_space<vmem>>, vector<16x128xf32>
      tpu.vector_store %arg5[%c0_20, %c0_21], %25 {strides = array<i32>} : memref<16x128xf32, #tpu.memory_space<vmem>>, vector<16x128xf32>,
    } else {
    }
    %c0 = arith.constant 0 : index
    %c0_1 = arith.constant 0 : index
    %3 = vector.load %arg1[%c0, %c0_1] : memref<16x128xf32, #tpu.memory_space<vmem>>, vector<16x128xf32>
    %cst = arith.constant 5.000000e-01 : f32
    %4 = vector.broadcast %cst : f32 to vector<16x128xf32>
    %5 = arith.mulf %4, %3 : vector<16x128xf32>
    %6 = math.tanh %5 : vector<16x128xf32>
    %cst_2 = arith.constant 1.000000e+00 : f32
    %7 = vector.broadcast %cst_2 : f32 to vector<16x128xf32>
    %8 = arith.addf %6, %7 : vector<16x128xf32>
    %cst_3 = arith.constant 5.000000e-01 : f32
    %9 = vector.broadcast %cst_3 : f32 to vector<16x128xf32>
    %10 = arith.mulf %9, %8 : vector<16x128xf32>
    %c0_4 = arith.constant 0 : index
    %c0_5 = arith.constant 0 : index
    %11 = vector.load %arg2[%c0_4, %c0_5] : memref<16x128xf32, #tpu.memory_space<vmem>>, vector<16x128xf32>
    %c0_6 = arith.constant 0 : index
    %c0_7 = arith.constant 0 : index
    %12 = vector.load %arg4[%c0_6, %c0_7] : memref<16x128xf32, #tpu.memory_space<vmem>>, vector<16x128xf32>
    %13 = arith.mulf %10, %11 : vector<16x128xf32>
    %14 = arith.addf %12, %13 : vector<16x128xf32>
    %c0_8 = arith.constant 0 : index
    %c0_9 = arith.constant 0 : index
    %15 = vector.load %arg4[%c0_8, %c0_9] : memref<16x128xf32, #tpu.memory_space<vmem>>, vector<16x128xf32>
    tpu.vector_store %arg4[%c0_8, %c0_9], %14 {strides = array<i32>} : memref<16x128xf32, #tpu.memory_space<vmem>>, vector<16x128xf32>,
    %c0_10 = arith.constant 0 : index
    %c0_11 = arith.constant 0 : index
    %16 = vector.load %arg5[%c0_10, %c0_11] : memref<16x128xf32, #tpu.memory_space<vmem>>, vector<16x128xf32>
    %17 = arith.addf %10, %11 : vector<16x128xf32>
    %18 = arith.addf %16, %17 : vector<16x128xf32>
    %c0_12 = arith.constant 0 : index
    %c0_13 = arith.constant 0 : index
    %19 = vector.load %arg5[%c0_12, %c0_13] : memref<16x128xf32, #tpu.memory_space<vmem>>, vector<16x128xf32>
    tpu.vector_store %arg5[%c0_12, %c0_13], %18 {strides = array<i32>} : memref<16x128xf32, #tpu.memory_space<vmem>>, vector<16x128xf32>,
    %c0_i32_14 = arith.constant 0 : i32
    %20 = arith.cmpi eq, %arg0, %c0_i32_14 : i32
    %21 = arith.extui %20 : i1 to i32
    %c0_i32_15 = arith.constant 0 : i32
    %22 = arith.cmpi ne, %21, %c0_i32_15 : i32
    scf.if %22 {
      %c0_16 = arith.constant 0 : index
      %c0_17 = arith.constant 0 : index
      %23 = vector.load %arg4[%c0_16, %c0_17] : memref<16x128xf32, #tpu.memory_space<vmem>>, vector<16x128xf32>
      %cst_18 = arith.constant dense<0.000000e+00> : vector<128xf32>
      %24 = vector.multi_reduction <add>, %23, %cst_18 [0] : vector<16x128xf32> to vector<128xf32>
      %25 = vector.shape_cast %24 : vector<128xf32> to vector<1x128xf32>
      %c0_19 = arith.constant 0 : index
      %c0_20 = arith.constant 0 : index
      %26 = vector.load %arg3[%c0_19, %c0_20] : memref<2x128xf32, #tpu.memory_space<vmem>>, vector<1x128xf32>
      tpu.vector_store %arg3[%c0_19, %c0_20], %25 {strides = array<i32>} : memref<2x128xf32, #tpu.memory_space<vmem>>, vector<1x128xf32>,
      %c0_21 = arith.constant 0 : index
      %c0_22 = arith.constant 0 : index
      %27 = vector.load %arg5[%c0_21, %c0_22] : memref<16x128xf32, #tpu.memory_space<vmem>>, vector<16x128xf32>
      %cst_23 = arith.constant dense<0.000000e+00> : vector<128xf32>
      %28 = vector.multi_reduction <add>, %27, %cst_23 [0] : vector<16x128xf32> to vector<128xf32>
      %29 = vector.shape_cast %28 : vector<128xf32> to vector<1x128xf32>
      %c1 = arith.constant 1 : index
      %c0_24 = arith.constant 0 : index
      %30 = vector.load %arg3[%c1, %c0_24] : memref<2x128xf32, #tpu.memory_space<vmem>>, vector<1x128xf32>
      tpu.vector_store %arg3[%c1, %c0_24], %29 {strides = array<i32>} : memref<2x128xf32, #tpu.memory_space<vmem>>, vector<1x128xf32>,
    } else {
    }
    return
  }
  func.func @transform_0(%arg0: i32) -> (i32, i32) {
    %c0_i32 = arith.constant 0 : i32
    %c0_i32_0 = arith.constant 0 : i32
    return %arg0, %c0_i32 : i32, i32
  }
  func.func @transform_1(%arg0: i32) -> (i32, i32) {
    %c0_i32 = arith.constant 0 : i32
    %c0_i32_0 = arith.constant 0 : i32
    return %arg0, %c0_i32 : i32, i32
  }
  func.func @transform_2(%arg0: i32) -> (i32, i32) {
    %c0_i32 = arith.constant 0 : i32
    %c0_i32_0 = arith.constant 0 : i32
    %c0_i32_1 = arith.constant 0 : i32
    return %c0_i32, %c0_i32_0 : i32, i32
  }
}

</mosaic_0001>

<bundles_post_ra>
// kernel: dice_loss.1
= control target key start
LH: loop header
LB: loop body
LE: loop exit
PB: predicated region body
PF: predicated region fallthrough
CT: control target
= control target key end

     0   :  { %s111_s0 = inlined_call_operand.vmem [shape: f32[16,128], index: 0, kind: input, shape index: {}]   ;;  %s112_s1 = inlined_call_operand.vmem [shape: f32[16,128], index: 1, kind: input, shape index: {}]   ;;  %s113_s2 = inlined_call_operand.vmem [shape: f32[2,128], index: 2, kind: output, shape index: {}]  }
   0x1   :  { %v19_v0 = vld [vmem:[%s111_s0] sm:$0xff]  ;;  %v20_v1 = vld [vmem:[%s111_s0 + $0x8] sm:$0xff] }
   0x2   :  { %v21_v2 = vmul.f32 0.5, %v19_v0  ;;  %v22_v3 = vmul.f32 0.5, %v20_v1  ;;  %v29_v8 = vld [vmem:[%s112_s1] sm:$0xff]  ;;  %v30_v10 = vld [vmem:[%s112_s1 + $0x8] sm:$0xff] }
   0x4   :  { %74 = vtanh.f32 %v21_v2 }
   0x5   :  { %76 = vtanh.f32 %v22_v3 }
  0x11   :  { %v75_v4 = vpop.eup %74 }
  0x12   :  { %v77_v5 = vpop.eup %76  ;;  %v25_v6 = vadd.f32 1.0, %v75_v4 }
  0x13   :  { %v26_v7 = vadd.f32 1.0, %v77_v5 }
  0x14   :  { %v27_v9 = vmul.f32 0.5, %v25_v6 }
  0x15   :  { %v28_v11 = vmul.f32 0.5, %v26_v7 }
  0x16   :  { %v33_v12 = vmul.f32 %v29_v8, %v27_v9  ;;  %v41_v13 = vadd.f32 %v29_v8, %v27_v9 }
  0x17   :  { %v34_v14 = vmul.f32 %v30_v10, %v28_v11  ;;  %v42_v15 = vadd.f32 %v30_v10, %v28_v11 }
  0x19   :  { %v52_v16 = vadd.f32 %v34_v14, %v33_v12  ;;  %v62_v17 = vadd.f32 %v42_v15, %v41_v13 }
  0x1b   :  { %v53_v18 = vrot.slane %v52_v16, 4  ;;  %v63_v19 = vrot.slane %v62_v17, 4 }
  0x1d   :  { %v54_v20 = vadd.f32 %v53_v18, %v52_v16  ;;  %v64_v21 = vadd.f32 %v63_v19, %v62_v17 }
  0x1f   :  { %v55_v22 = vrot.slane %v54_v20, 2  ;;  %v65_v23 = vrot.slane %v64_v21, 2 }
  0x21   :  { %v56_v24 = vadd.f32 %v55_v22, %v54_v20  ;;  %v66_v25 = vadd.f32 %v65_v23, %v64_v21 }
  0x23   :  { %v57_v26 = vrot.slane %v56_v24, 1  ;;  %v67_v27 = vrot.slane %v66_v25, 1 }
  0x25   :  { %v58_v28 = vadd.f32 %v57_v26, %v56_v24  ;;  %v68_v29 = vadd.f32 %v67_v27, %v66_v25 }
  0x27   :  { %59 = vst [vmem:[%s113_s2] sm:$0x1] %v58_v28  ;;  %69 = vst [vmem:[%s113_s2 + $0x1] sm:$0x1] %v68_v29 }

</bundles_post_ra>
